<compile_context>
chip_gen: v6e
topology: v6e:2x2x1
jax: 0.10.0
libtpu: 0.0.40
codegen_flags: <defaults>
</compile_context>

<pallas_src>
import functools

import jax
import jax.numpy as jnp
from jax import lax
from jax.experimental import pallas as pl
from jax.experimental.pallas import tpu as pltpu


def dqn_kernel(alpha_ref,            # SMEM (3,) PReLU alphas
               x_ref,                # (TILE_B, in) -- natural layout
               w1_ref, b1_ref,       # (h, in),  (h, 1)
               w2_ref, b2_ref,       # (h, h),   (h, 1)
               w3_ref, b3_ref,       # (h, h),   (h, 1)
               w4_ref, b4_ref,       # (out, h), (out, 1)
               o_ref,                # (out, TILE_B)
               *, matmul_dtype):
    # Hoist SMEM scalar loads out of the matmul/epilogue chain.
    a0 = alpha_ref[0]
    a1 = alpha_ref[1]
    a2 = alpha_ref[2]

    md = matmul_dtype
    x = x_ref[...].astype(md)                        # (TILE_B, in)

    # h = W1 @ x^T : contract the feature axis of BOTH operands so the
    # activations are lane-major (hidden, TILE_B) with batch on the lanes.
    h = lax.dot_general(
        w1_ref[...].astype(md), x,
        dimension_numbers=(((1,), (1,)), ((), ())),
        preferred_element_type=jnp.float32) + b1_ref[...]
    h = jnp.where(h >= 0, h, a0 * h)                 # PReLU (f32 epilogue)

    h = jnp.dot(w2_ref[...].astype(md), h.astype(md),
                preferred_element_type=jnp.float32) + b2_ref[...]
    h = jnp.where(h >= 0, h, a1 * h)

    h = jnp.dot(w3_ref[...].astype(md), h.astype(md),
                preferred_element_type=jnp.float32) + b3_ref[...]
    h = jnp.where(h >= 0, h, a2 * h)

    out = jnp.dot(w4_ref[...].astype(md), h.astype(md),
                  preferred_element_type=jnp.float32) + b4_ref[...]
    o_ref[...] = out.astype(o_ref.dtype)


def _round_up(n, m):
    return ((n + m - 1) // m) * m


def _pick_tile_b(batch):
    # Fewer, fatter grid steps (per-step fixed overhead ~0.35us dominates the
    # ~1 MFLOP of work), but keep >= 2 steps when possible so v7x's two
    # TensorCores both get a share, and cap at 1024 so the f32
    # (hidden, tile_b) intermediates stay out of vreg-spill territory.
    # The same choice is fine on v5e/v6e (single TC, tile_b is just MXU N).
    return max(256, min(1024, _round_up(pl.cdiv(batch, 2), 256)))


def dqn_forward(x, params, *, tile_b=None, matmul_dtype=jnp.float32,
                small_batch_cutoff=64):
    """Fused MLP forward. x: (B, input_size) -> (B, output_size)."""
    B, in_dim = x.shape
    hidden = params["w1"].shape[0]
    out_dim = params["w4"].shape[0]

    # Acting-sized batches: kernel launch + tiling overhead beats the work;
    # let XLA's fused path handle it.
    if B <= small_batch_cutoff:
        return reference_forward(x, params)

    if tile_b is None:
        tile_b = _pick_tile_b(B)
    assert tile_b % 128 == 0, "tile_b must be lane-aligned (multiple of 128)"
    n_tiles = pl.cdiv(B, tile_b)   # ragged last tile is fine: OOB writes masked

    const = lambda i: (0, 0)       # weights/biases: one block, VMEM-resident
    kernel = functools.partial(dqn_kernel, matmul_dtype=matmul_dtype)

    out_t = pl.pallas_call(
        kernel,
        out_shape=jax.ShapeDtypeStruct((out_dim, B), jnp.float32),
        grid=(n_tiles,),
        in_specs=[
            pl.BlockSpec(memory_space=pltpu.MemorySpace.SMEM),   # alphas
            pl.BlockSpec((tile_b, in_dim), lambda i: (i, 0)),    # x (natural layout)
            pl.BlockSpec((hidden, in_dim), const),               # w1
            pl.BlockSpec((hidden, 1), const),                    # b1
            pl.BlockSpec((hidden, hidden), const),               # w2
            pl.BlockSpec((hidden, 1), const),                    # b2
            pl.BlockSpec((hidden, hidden), const),               # w3
            pl.BlockSpec((hidden, 1), const),                    # b3
            pl.BlockSpec((out_dim, hidden), const),              # w4
            pl.BlockSpec((out_dim, 1), const),                   # b4
        ],
        out_specs=pl.BlockSpec((out_dim, tile_b), lambda i: (0, i)),
        compiler_params=pltpu.CompilerParams(
            # Batch tiles are independent -> megacore sharding on v7x.
            dimension_semantics=("parallel",),
        ),
    )(params["alphas"], x.astype(jnp.float32),
      params["w1"], params["b1"],
      params["w2"], params["b2"],
      params["w3"], params["b3"],
      params["w4"], params["b4"])

    return jnp.transpose(out_t)                      # (B, out_dim) -- tiny


def init_params(key, input_size, hidden, output_size):
    """Deterministic synthetic init (matches nn.Linear/PReLU shapes, not values).

    Weights use PyTorch (out_features, in_features) layout; biases are (out, 1).
    """
    ks = jax.random.split(key, 8)

    def linear(kw, kb, fan_in, fan_out):
        bound = 1.0 / jnp.sqrt(jnp.float32(fan_in))
        w = jax.random.uniform(kw, (fan_out, fan_in), jnp.float32, -bound, bound)
        b = jax.random.uniform(kb, (fan_out, 1), jnp.float32, -bound, bound)
        return w, b

    w1, b1 = linear(ks[0], ks[1], input_size, hidden)
    w2, b2 = linear(ks[2], ks[3], hidden, hidden)
    w3, b3 = linear(ks[4], ks[5], hidden, hidden)
    w4, b4 = linear(ks[6], ks[7], hidden, output_size)
    alphas = jnp.full((3,), 0.25, jnp.float32)  # PReLU default init

    return dict(w1=w1, b1=b1, w2=w2, b2=b2, w3=w3, b3=b3,
                w4=w4, b4=b4, alphas=alphas)


def reference_forward(x, p):
    """Pure-JAX reference of the same forward pass (PyTorch layout).

    Also used as the small-batch (acting) fast path.
    """
    h = x @ p["w1"].T + p["b1"][:, 0]
    h = jnp.where(h >= 0, h, p["alphas"][0] * h)
    h = h @ p["w2"].T + p["b2"][:, 0]
    h = jnp.where(h >= 0, h, p["alphas"][1] * h)
    h = h @ p["w3"].T + p["b3"][:, 0]
    h = jnp.where(h >= 0, h, p["alphas"][2] * h)
    return h @ p["w4"].T + p["b4"][:, 0]


if __name__ == "__main__":
    # layer_sizes consistent with a CartPole DQN: [4, 32, 2]
    input_size, hidden, output_size = 4, 32, 2

    key = jax.random.PRNGKey(0)
    k_params, k_x1, k_x2, k_x3 = jax.random.split(key, 4)
    params = init_params(k_params, input_size, hidden, output_size)

    # Acting-sized batch -> pure-JAX fast path (no kernel launch).
    x_small = jax.random.normal(k_x1, (8, input_size), jnp.float32)
    out_small = jax.block_until_ready(dqn_forward(x_small, params))
    ref_small = reference_forward(x_small, params)
    assert out_small.shape == (8, output_size)
    assert jnp.allclose(out_small, ref_small, atol=1e-5, rtol=1e-5), "mismatch (B=8)"

    # Replay-buffer-sized batch -> Pallas kernel, auto tile (2 tiles of 256,
    # ragged last block: no host-side pad, Pallas masks OOB writes).
    x_replay = jax.random.normal(k_x2, (300, input_size), jnp.float32)
    out_replay = jax.block_until_ready(dqn_forward(x_replay, params))
    ref_replay = reference_forward(x_replay, params)
    assert out_replay.shape == (300, output_size)
    assert jnp.allclose(out_replay, ref_replay, atol=1e-4, rtol=1e-4), "mismatch (B=300)"

    # Larger batch -> exercises the fat 1024 tile (2 parallel grid steps).
    x_large = jax.random.normal(k_x3, (2048, input_size), jnp.float32)
    out_large = jax.block_until_ready(dqn_forward(x_large, params))
    ref_large = reference_forward(x_large, params)
    assert out_large.shape == (2048, output_size)
    assert jnp.allclose(out_large, ref_large, atol=1e-4, rtol=1e-4), "mismatch (B=2048)"

    # bf16 matmul path (f32 accumulation + f32 bias/PReLU epilogue).
    out_bf16 = jax.block_until_ready(
        dqn_forward(x_large, params, matmul_dtype=jnp.bfloat16))
    assert jnp.allclose(out_bf16, ref_large, atol=5e-2, rtol=5e-2), "mismatch (bf16)"

    print("KERNEL_OK")
</pallas_src>

<mosaic_0001>
module attributes {stable_mosaic.version = 11 : i64} {
  func.func @dqn_kernel(%arg0: i32, %arg1: memref<3xf32, #tpu.memory_space<smem>>, %arg2: memref<256x4xf32, #tpu.memory_space<vmem>>, %arg3: memref<32x4xf32, #tpu.memory_space<vmem>>, %arg4: memref<32x1xf32, #tpu.memory_space<vmem>>, %arg5: memref<32x32xf32, #tpu.memory_space<vmem>>, %arg6: memref<32x1xf32, #tpu.memory_space<vmem>>, %arg7: memref<32x32xf32, #tpu.memory_space<vmem>>, %arg8: memref<32x1xf32, #tpu.memory_space<vmem>>, %arg9: memref<2x32xf32, #tpu.memory_space<vmem>>, %arg10: memref<2x1xf32, #tpu.memory_space<vmem>>, %arg11: memref<2x256xf32, #tpu.memory_space<vmem>>) attributes {dimension_semantics = [#tpu.dimension_semantics<parallel>], iteration_bounds = array<i64: 2>, scalar_prefetch = 0 : i64, scratch_operands = 0 : i64, tpu.core_type = #tpu.core_type<tc>, window_params = [{transform_indices = @transform_0, window_bounds = array<i64: 3>}, {transform_indices = @transform_1, window_bounds = array<i64: 256, 4>}, {pipeline_mode = #tpu.pipeline_mode<synchronous>, transform_indices = @transform_2, window_bounds = array<i64: 32, 4>}, {pipeline_mode = #tpu.pipeline_mode<synchronous>, transform_indices = @transform_3, window_bounds = array<i64: 32, 1>}, {pipeline_mode = #tpu.pipeline_mode<synchronous>, transform_indices = @transform_4, window_bounds = array<i64: 32, 32>}, {pipeline_mode = #tpu.pipeline_mode<synchronous>, transform_indices = @transform_5, window_bounds = array<i64: 32, 1>}, {pipeline_mode = #tpu.pipeline_mode<synchronous>, transform_indices = @transform_6, window_bounds = array<i64: 32, 32>}, {pipeline_mode = #tpu.pipeline_mode<synchronous>, transform_indices = @transform_7, window_bounds = array<i64: 32, 1>}, {pipeline_mode = #tpu.pipeline_mode<synchronous>, transform_indices = @transform_8, window_bounds = array<i64: 2, 32>}, {pipeline_mode = #tpu.pipeline_mode<synchronous>, transform_indices = @transform_9, window_bounds = array<i64: 2, 1>}, {transform_indices = @transform_10, window_bounds = array<i64: 2, 256>}]} {
    %c0 = arith.constant 0 : index
    %0 = memref.load %arg1[%c0] : memref<3xf32, #tpu.memory_space<smem>>
    %c1 = arith.constant 1 : index
    %1 = memref.load %arg1[%c1] : memref<3xf32, #tpu.memory_space<smem>>
    %c2 = arith.constant 2 : index
    %2 = memref.load %arg1[%c2] : memref<3xf32, #tpu.memory_space<smem>>
    %c0_0 = arith.constant 0 : index
    %c0_1 = arith.constant 0 : index
    %3 = vector.load %arg2[%c0_0, %c0_1] : memref<256x4xf32, #tpu.memory_space<vmem>>, vector<256x4xf32>
    %c0_2 = arith.constant 0 : index
    %c0_3 = arith.constant 0 : index
    %4 = vector.load %arg3[%c0_2, %c0_3] : memref<32x4xf32, #tpu.memory_space<vmem>>, vector<32x4xf32>
    %cst = arith.constant dense<0.000000e+00> : vector<32x256xf32>
    %5 = tpu.matmul %4, %3, %cst {dimension_numbers = #tpu.dot_dimension_numbers<[1], [1], [0], [0], [0, 0, 1, 0], [], []>} : vector<32x4xf32>, vector<256x4xf32>, vector<32x256xf32> -> vector<32x256xf32>
    %c0_4 = arith.constant 0 : index
    %c0_5 = arith.constant 0 : index
    %6 = vector.load %arg4[%c0_4, %c0_5] : memref<32x1xf32, #tpu.memory_space<vmem>>, vector<32x1xf32>
    %7 = vector.broadcast %6 : vector<32x1xf32> to vector<32x256xf32>
    %8 = arith.addf %5, %7 : vector<32x256xf32>
    %cst_6 = arith.constant 0.000000e+00 : f32
    %9 = vector.broadcast %cst_6 : f32 to vector<32x256xf32>
    %10 = arith.cmpf oge, %8, %9 : vector<32x256xf32>
    %11 = vector.broadcast %0 : f32 to vector<32x256xf32>
    %12 = arith.mulf %11, %8 : vector<32x256xf32>
    %13 = arith.select %10, %8, %12 : vector<32x256xi1>, vector<32x256xf32>
    %c0_7 = arith.constant 0 : index
    %c0_8 = arith.constant 0 : index
    %14 = vector.load %arg5[%c0_7, %c0_8] : memref<32x32xf32, #tpu.memory_space<vmem>>, vector<32x32xf32>
    %cst_9 = arith.constant dense<0.000000e+00> : vector<32x256xf32>
    %15 = tpu.matmul %14, %13, %cst_9 {dimension_numbers = #tpu.dot_dimension_numbers<[1], [0], [0], [1], [0, 0, 1, 1], [], []>} : vector<32x32xf32>, vector<32x256xf32>, vector<32x256xf32> -> vector<32x256xf32>
    %c0_10 = arith.constant 0 : index
    %c0_11 = arith.constant 0 : index
    %16 = vector.load %arg6[%c0_10, %c0_11] : memref<32x1xf32, #tpu.memory_space<vmem>>, vector<32x1xf32>
    %17 = vector.broadcast %16 : vector<32x1xf32> to vector<32x256xf32>
    %18 = arith.addf %15, %17 : vector<32x256xf32>
    %cst_12 = arith.constant 0.000000e+00 : f32
    %19 = vector.broadcast %cst_12 : f32 to vector<32x256xf32>
    %20 = arith.cmpf oge, %18, %19 : vector<32x256xf32>
    %21 = vector.broadcast %1 : f32 to vector<32x256xf32>
    %22 = arith.mulf %21, %18 : vector<32x256xf32>
    %23 = arith.select %20, %18, %22 : vector<32x256xi1>, vector<32x256xf32>
    %c0_13 = arith.constant 0 : index
    %c0_14 = arith.constant 0 : index
    %24 = vector.load %arg7[%c0_13, %c0_14] : memref<32x32xf32, #tpu.memory_space<vmem>>, vector<32x32xf32>
    %cst_15 = arith.constant dense<0.000000e+00> : vector<32x256xf32>
    %25 = tpu.matmul %24, %23, %cst_15 {dimension_numbers = #tpu.dot_dimension_numbers<[1], [0], [0], [1], [0, 0, 1, 1], [], []>} : vector<32x32xf32>, vector<32x256xf32>, vector<32x256xf32> -> vector<32x256xf32>
    %c0_16 = arith.constant 0 : index
    %c0_17 = arith.constant 0 : index
    %26 = vector.load %arg8[%c0_16, %c0_17] : memref<32x1xf32, #tpu.memory_space<vmem>>, vector<32x1xf32>
    %27 = vector.broadcast %26 : vector<32x1xf32> to vector<32x256xf32>
    %28 = arith.addf %25, %27 : vector<32x256xf32>
    %cst_18 = arith.constant 0.000000e+00 : f32
    %29 = vector.broadcast %cst_18 : f32 to vector<32x256xf32>
    %30 = arith.cmpf oge, %28, %29 : vector<32x256xf32>
    %31 = vector.broadcast %2 : f32 to vector<32x256xf32>
    %32 = arith.mulf %31, %28 : vector<32x256xf32>
    %33 = arith.select %30, %28, %32 : vector<32x256xi1>, vector<32x256xf32>
    %c0_19 = arith.constant 0 : index
    %c0_20 = arith.constant 0 : index
    %34 = vector.load %arg9[%c0_19, %c0_20] : memref<2x32xf32, #tpu.memory_space<vmem>>, vector<2x32xf32>
    %cst_21 = arith.constant dense<0.000000e+00> : vector<2x256xf32>
    %35 = tpu.matmul %34, %33, %cst_21 {dimension_numbers = #tpu.dot_dimension_numbers<[1], [0], [0], [1], [0, 0, 1, 1], [], []>} : vector<2x32xf32>, vector<32x256xf32>, vector<2x256xf32> -> vector<2x256xf32>
    %c0_22 = arith.constant 0 : index
    %c0_23 = arith.constant 0 : index
    %36 = vector.load %arg10[%c0_22, %c0_23] : memref<2x1xf32, #tpu.memory_space<vmem>>, vector<2x1xf32>
    %37 = vector.broadcast %36 : vector<2x1xf32> to vector<2x256xf32>
    %38 = arith.addf %35, %37 : vector<2x256xf32>
    %c0_24 = arith.constant 0 : index
    %c0_25 = arith.constant 0 : index
    %39 = vector.load %arg11[%c0_24, %c0_25] : memref<2x256xf32, #tpu.memory_space<vmem>>, vector<2x256xf32>
    tpu.vector_store %arg11[%c0_24, %c0_25], %38 {strides = array<i32>} : memref<2x256xf32, #tpu.memory_space<vmem>>, vector<2x256xf32>,
    return
  }
  func.func @transform_0(%arg0: i32) -> i32 {
    %c0_i32 = arith.constant 0 : i32
    %c0_i32_0 = arith.constant 0 : i32
    return %c0_i32 : i32
  }
  func.func @transform_1(%arg0: i32) -> (i32, i32) {
    %c0_i32 = arith.constant 0 : i32
    %c0_i32_0 = arith.constant 0 : i32
    return %arg0, %c0_i32 : i32, i32
  }
  func.func @transform_2(%arg0: i32) -> (i32, i32) {
    %c0_i32 = arith.constant 0 : i32
    %c0_i32_0 = arith.constant 0 : i32
    %c0_i32_1 = arith.constant 0 : i32
    return %c0_i32, %c0_i32_0 : i32, i32
  }
  func.func @transform_3(%arg0: i32) -> (i32, i32) {
    %c0_i32 = arith.constant 0 : i32
    %c0_i32_0 = arith.constant 0 : i32
    %c0_i32_1 = arith.constant 0 : i32
    return %c0_i32, %c0_i32_0 : i32, i32
  }
  func.func @transform_4(%arg0: i32) -> (i32, i32) {
    %c0_i32 = arith.constant 0 : i32
    %c0_i32_0 = arith.constant 0 : i32
    %c0_i32_1 = arith.constant 0 : i32
    return %c0_i32, %c0_i32_0 : i32, i32
  }
  func.func @transform_5(%arg0: i32) -> (i32, i32) {
    %c0_i32 = arith.constant 0 : i32
    %c0_i32_0 = arith.constant 0 : i32
    %c0_i32_1 = arith.constant 0 : i32
    return %c0_i32, %c0_i32_0 : i32, i32
  }
  func.func @transform_6(%arg0: i32) -> (i32, i32) {
    %c0_i32 = arith.constant 0 : i32
    %c0_i32_0 = arith.constant 0 : i32
    %c0_i32_1 = arith.constant 0 : i32
    return %c0_i32, %c0_i32_0 : i32, i32
  }
  func.func @transform_7(%arg0: i32) -> (i32, i32) {
    %c0_i32 = arith.constant 0 : i32
    %c0_i32_0 = arith.constant 0 : i32
    %c0_i32_1 = arith.constant 0 : i32
    return %c0_i32, %c0_i32_0 : i32, i32
  }
  func.func @transform_8(%arg0: i32) -> (i32, i32) {
    %c0_i32 = arith.constant 0 : i32
    %c0_i32_0 = arith.constant 0 : i32
    %c0_i32_1 = arith.constant 0 : i32
    return %c0_i32, %c0_i32_0 : i32, i32
  }
  func.func @transform_9(%arg0: i32) -> (i32, i32) {
    %c0_i32 = arith.constant 0 : i32
    %c0_i32_0 = arith.constant 0 : i32
    %c0_i32_1 = arith.constant 0 : i32
    return %c0_i32, %c0_i32_0 : i32, i32
  }
  func.func @transform_10(%arg0: i32) -> (i32, i32) {
    %c0_i32 = arith.constant 0 : i32
    %c0_i32_0 = arith.constant 0 : i32
    return %c0_i32, %arg0 : i32, i32
  }
}

</mosaic_0001>

<bundles_post_ra>
// kernel: tpu_custom_call.1
= control target key start
LH: loop header
LB: loop body
LE: loop exit
PB: predicated region body
PF: predicated region fallthrough
CT: control target
= control target key end

     0   :  { %15 = vsyncpa [#allocation4], 0  ;;  %s1771_s0 = inlined_call_operand.vmem [shape: f32[3], index: 0, kind: input, shape index: {}]   ;;  %s1772_s1 = inlined_call_operand.vmem [shape: f32[300,4], index: 1, kind: input, shape index: {}]   ;;  %s1773_s2 = inlined_call_operand.vmem [shape: f32[32,4], index: 2, kind: input, shape index: {}]   ;;  %s1774_s3 = inlined_call_operand.vmem [shape: f32[32,1], index: 3, kind: input, shape index: {}]   ;;  %s1775_s4 = inlined_call_operand.vmem [shape: f32[32,32], index: 4, kind: input, shape index: {}]   ;;  %s1776_s5 = inlined_call_operand.vmem [shape: f32[32,1], index: 5, kind: input, shape index: {}]   ;;  %s1777_s6 = inlined_call_operand.vmem [shape: f32[32,32], index: 6, kind: input, shape index: {}]   ;;  %s1778_s7 = inlined_call_operand.vmem [shape: f32[32,1], index: 7, kind: input, shape index: {}]   ;;  %s1779_s8 = inlined_call_operand.vmem [shape: f32[2,32], index: 8, kind: input, shape index: {}]   ;;  %s1780_s9 = inlined_call_operand.vmem [shape: f32[2,1], index: 9, kind: input, shape index: {}]   ;;  %s1781_s10 = inlined_call_operand.hbm [shape: f32[2,300], index: 10, kind: output, shape index: {}]  }
   0x1   :  { %16 = vsyncpa [#allocation3], 0 }
   0x2   :  { %18 = vsyncpa [#allocation3 + $0x1], 0  ;;  %s1479_s13 = smov 0   ;;  %s1481_s14 = smov 0  }
   0x3   :  { %s1483_s15 = smov 0   ;;  %s1485_s16 = smov 0  }
   0x4 LB: > { %s1500_s17 = sadd.s32 4294967295, %s1418_s16   ;;  %s1179_s18 = sadd.s32 4294967294, %s1418_s16   ;;  %s1418_s16 = sphi %s1485_s16, %s1788_s16   ;;  %s1414_s15 = sphi %s1483_s15, %s1787_s15   ;;  %s1410_s14 = sphi %s1481_s14, %s1786_s14   ;;  %s1406_s13 = sphi %s1479_s13, %s1785_s13  }
   0x5   : > { %s1504_s19 = sadd.s32 1, %s1418_s16   ;;  %s246_s20 = sadd.s32 1, %s1414_s15 }
   0x6   : > { %s243_s21 = ssub.s32 %s1418_s16, %s1504_s19  ;;  %p256_p0 = scmp.ne.s32.totalorder %s1414_s15, %s1410_s14 }
   0x7   : > { %p244_p1 = scmp.eq.s32.totalorder %s243_s21, 0  ;;  %p257_p2 = scmp.eq.s32.totalorder %s1500_s17, 1 }
   0x8   : > { %p262_p3 = scmp.ne.s32.totalorder %s1410_s14, %s1406_s13  ;;  %p263_p4 = scmp.eq.s32.totalorder %s1179_s18, 1 }
   0x9   : > { %s1515_s22 = scalar_select %p244_p1, %s1414_s15, %s246_s20  }
   0xa   : > { %p1517_p5 = por %p257_p2, %p256_p0  ;;  %p1521_p6 = por %p263_p4, %p262_p3 }
   0xb   : > { %p1180_p7 = scmp.ge.s32.totalorder %s1418_s16, 1  ;;  %p270_p8 = scmp.lt.s32.totalorder %s1418_s16, 3 }
   0xc   : > { %p1299_p9 = scmp.eq.s32.totalorder %s1500_s17, 0  ;;  %s283_s28 = sshll.u32 %s1771_s0, 4  ;;  %s284_s28 = int_to_ptr.vmem [resolvable:$true] %s283_s28 }
   0xd   : > { %p1528_p10 = pnand %p1180_p7, %p270_p8  ;;  %s1339_s29 = scalar_lea.vmem %s284_s28, 16 }
   0xe   : > { %p1340_p13 = scmp.ne.s32.totalorder %s284_s28, %s1339_s29  ;;  %p1347_p3 = scmp.lt.s32.totalorder %s284_s28, %s284_s28 }
   0xf   : > { %p1291_p11 = pneg %p1528_p10  ;;  %p1348_p4 = scmp.lt.s32.totalorder %s1339_s29, %s1339_s29 }
  0x11   : > { %p1292_p12 = pnand %p1299_p9, %p1291_p11  ;;  %p1349_p7 = por %p1348_p4, %p1347_p3 }
  0x13   : > { %p1341_p0 = pneg %p1292_p12 }
  0x15   : > { %p1342_p1 = pnand %p1341_p0, %p1340_p13 }
  0x17   : > { %p1343_p2 = pneg %p1342_p1 }
  0x19   : > { %p1350_p8 = pnand %p1349_p7, %p1343_p2 }
  0x1b   : > { %1353 = shalt.err (!%p1350_p8)
}
  0x1c   : > { %s1420_s30 = smov [#allocation2]   ;;  %337 = sbr.rel (%p1528_p10) target bundleno = 993 (0x3e1), region = 60 }
  0x1d   : > { %1294 = dma.vmem_to_smem (!%p1292_p12), %s284_s28, 16, %s1420_s30, [#allocation4]  }
  0x21   : > { %1397 = dma.done.wait (%p1299_p9), [#allocation4], 16  }
  0x22   : > { %1399 = vsyncadd (%p1299_p9), [#allocation4], 4294967280 }
  0x23   : > { %343 = sfence }
  0x24   : > { %s1186_s11 = sshll.u32 %s1500_s17, 5  ;;  %vm462_vm0 = vcmask 31744   ;;  %v1549_v0 = vld [vmem:[%s1773_s2] sm:$0xff]  ;;  %v1421_v1 = vmov 0   ;;  %v441_v2 = vld [vmem:[%s1774_s3 + $0x18] sm:$0xff]  ;;  %v439_v3 = vld [vmem:[%s1774_s3 + $0x8] sm:$0xff] }
  0x25   : > { %p385_p11 = scmp.lt.s32.totalorder %s1186_s11, 37  ;;  %1278 = vmatprep.mubr.msk.f32.mxu0 %vm462_vm0, %v1549_v0  ;;  %1337 = vset.pattern.permute.xlu0 %v1421_v1  ;;  %v440_v4 = vld [vmem:[%s1774_s3 + $0x10] sm:$0xff]  ;;  %v438_v5 = vld [vmem:[%s1774_s3] sm:$0xff]  ;;  %v692_v6 = vld [vmem:[%s1776_s5 + $0x18] sm:$0xff]  ;;  %v1422_v50 = vmov 0.0   ;;  %s399_s27 = sld [smem:[#allocation2]] }
  0x26   : > { %459 = vperm.xlu0 %1337, %v441_v2   ;;  %1338 = vset.pattern.permute.xlu1 %v1421_v1  ;;  %v691_v10 = vld [vmem:[%s1776_s5 + $0x10] sm:$0xff]  ;;  %v690_v13 = vld [vmem:[%s1776_s5 + $0x8] sm:$0xff]  ;;  %v689_v14 = vld [vmem:[%s1776_s5] sm:$0xff]  ;;  %vm713_vm9 = vcmask 261120   ;;  %s1189_s25 = sld [smem:[#allocation2 + $0x2]]  ;;  %s1237_s30 = sshll.u32 (%p1517_p5), %s1500_s17, 1 }
  0x27   : > { %s1790_s11 = smov (!%p385_p11, %s1186_s11), 37  ;;  %449 = vperm.xlu1 %1338, %v439_v3   ;;  %v847_v17 = vld [vmem:[%s1778_s7 + $0x18] sm:$0xff]  ;;  %v846_v18 = vld [vmem:[%s1778_s7 + $0x10] sm:$0xff]  ;;  %v845_v21 = vld [vmem:[%s1778_s7 + $0x8] sm:$0xff]  ;;  %790 = vmatprep.mubr.f32.mxu1 %v1422_v50 }
  0x28   : > { %s1187_s12 = sshll.u32 %s1790_s11, 3  ;;  %v844_v22 = vld [vmem:[%s1778_s7] sm:$0xff]  ;;  %v435_v47 = vld [vmem:[%s1773_s2 + $0x8] sm:$0xff]  ;;  %v436_v48 = vld [vmem:[%s1773_s2 + $0x10] sm:$0xff]  ;;  %s377_s11 = sand.u32 1, %s1410_s14  }
  0x29   : > { %s1568_s21 = scalar_lea.vmem %s1772_s1, %s1187_s12  ;;  %v995_v25 = vld [vmem:[%s1780_s9] sm:$0x3]  ;;  %v437_v49 = vld [vmem:[%s1773_s2 + $0x18] sm:$0xff]  ;;  %s1724_s29 = scalar_lea.sflag [#allocation3], %s377_s11 }
  0x2a   : > { %454 = vperm.xlu0 %1337, %v440_v4   ;;  %v433_v7 = vld [vmem:[%s1568_s21 + $0xf8] sm:$0xff]  ;;  %v432_v9 = vld [vmem:[%s1568_s21 + $0xf0] sm:$0xff]  ;;  %v431_v12 = vld [vmem:[%s1568_s21 + $0xe8] sm:$0xff]  ;;  %s1096_s12 = ssub.s32 (%p1517_p5), 3, %s1237_s30 }
  0x2b   : > { %v417_v8 = vld [vmem:[%s1568_s21 + $0x78] sm:$0xff]  ;;  %444 = vperm.xlu1 %1338, %v438_v5   ;;  %1246 = vmatprep.subr.msk.mxu0 %vm462_vm0, %v433_v7  ;;  %v416_v11 = vld [vmem:[%s1568_s21 + $0x70] sm:$0xff]  ;;  %v415_v15 = vld [vmem:[%s1568_s21 + $0x68] sm:$0xff]  ;;  %v668_v2 = vstv %s399_s27  ;;  %s1185_s27 = sshll.u32 %s377_s11, 2  ;;  %p1097_p9 = scmp.lt.s32.totalorder (%p1517_p5), %s1096_s12, 2 }
  0x2c   : > { %1247 = vmatpush3.xpose.msk.msra.mxu0 %vm462_vm0, %v417_v8  ;;  %v430_v16 = vld [vmem:[%s1568_s21 + $0xe0] sm:$0xff]  ;;  %v429_v20 = vld [vmem:[%s1568_s21 + $0xd8] sm:$0xff]  ;;  %v428_v24 = vld [vmem:[%s1568_s21 + $0xd0] sm:$0xff]  ;;  %s379_s28 = scalar_lea.vmem [#allocation5], %s1185_s27 }
  0x2d   : > { %1248 = vmatprep.subr.msk.mxu0 %vm462_vm0, %v432_v9  ;;  %v414_v19 = vld [vmem:[%s1568_s21 + $0x60] sm:$0xff]  ;;  %v413_v23 = vld [vmem:[%s1568_s21 + $0x58] sm:$0xff]  ;;  %v412_v26 = vld [vmem:[%s1568_s21 + $0x50] sm:$0xff] }
  0x2e   : > { %710 = vperm.xlu0 %1337, %v692_v6   ;;  %v427_v27 = vld [vmem:[%s1568_s21 + $0xc8] sm:$0xff]  ;;  %v426_v29 = vld [vmem:[%s1568_s21 + $0xc0] sm:$0xff]  ;;  %v425_v31 = vld [vmem:[%s1568_s21 + $0xb8] sm:$0xff] }
  0x2f   : > { %705 = vperm.xlu1 %1338, %v691_v10   ;;  %v411_v28 = vld [vmem:[%s1568_s21 + $0x48] sm:$0xff]  ;;  %v410_v30 = vld [vmem:[%s1568_s21 + $0x40] sm:$0xff]  ;;  %v409_v32 = vld [vmem:[%s1568_s21 + $0x38] sm:$0xff] }
  0x30   : > { %1249 = vmatpush3.xpose.msk.msra.mxu0 %vm462_vm0, %v416_v11  ;;  %v424_v33 = vld [vmem:[%s1568_s21 + $0xb0] sm:$0xff]  ;;  %v423_v35 = vld [vmem:[%s1568_s21 + $0xa8] sm:$0xff]  ;;  %v422_v37 = vld [vmem:[%s1568_s21 + $0xa0] sm:$0xff] }
  0x31   : > { %1250 = vmatprep.subr.msk.mxu0 %vm462_vm0, %v431_v12  ;;  %v408_v34 = vld [vmem:[%s1568_s21 + $0x30] sm:$0xff]  ;;  %v407_v36 = vld [vmem:[%s1568_s21 + $0x28] sm:$0xff]  ;;  %v406_v38 = vld [vmem:[%s1568_s21 + $0x20] sm:$0xff] }
  0x32   : > { %700 = vperm.xlu0 %1337, %v690_v13   ;;  %v421_v39 = vld [vmem:[%s1568_s21 + $0x98] sm:$0xff]  ;;  %v420_v41 = vld [vmem:[%s1568_s21 + $0x90] sm:$0xff]  ;;  %v419_v43 = vld [vmem:[%s1568_s21 + $0x88] sm:$0xff] }
  0x33   : > { %695 = vperm.xlu1 %1338, %v689_v14   ;;  %v405_v40 = vld [vmem:[%s1568_s21 + $0x18] sm:$0xff]  ;;  %v404_v42 = vld [vmem:[%s1568_s21 + $0x10] sm:$0xff]  ;;  %v403_v44 = vld [vmem:[%s1568_s21 + $0x8] sm:$0xff] }
  0x34   : > { %1251 = vmatpush3.xpose.msk.msra.mxu0 %vm462_vm0, %v415_v15  ;;  %v418_v45 = vld [vmem:[%s1568_s21 + $0x80] sm:$0xff] }
  0x35   : > { %1252 = vmatprep.subr.msk.mxu0 %vm462_vm0, %v430_v16  ;;  %v402_v46 = vld [vmem:[%s1568_s21] sm:$0xff]  ;;  %s1188_s21 = sld [smem:[#allocation2 + $0x1]] }
  0x36   : > { %865 = vperm.xlu0 %1337, %v847_v17  }
  0x37   : > { %860 = vperm.xlu1 %1338, %v846_v18  }
  0x38   : > { %1253 = vmatpush3.xpose.msk.msra.mxu0 %vm462_vm0, %v414_v19 }
  0x39   : > { %1254 = vmatprep.subr.msk.mxu0 %vm462_vm0, %v429_v20 }
  0x3a   : > { %855 = vperm.xlu0 %1337, %v845_v21  }
  0x3b   : > { %850 = vperm.xlu1 %1338, %v844_v22  }
  0x3c   : > { %1255 = vmatpush3.xpose.msk.msra.mxu0 %vm462_vm0, %v413_v23  ;;  %v685_v23 = vld [vmem:[%s1775_s4] sm:$0xff] }
  0x3d   : > { %1256 = vmatprep.subr.msk.mxu0 %vm462_vm0, %v428_v24 }
  0x3e   : > { %998 = vperm.xlu0 %1337, %v995_v25   ;;  %v686_v25 = vld [vmem:[%s1775_s4 + $0x8] sm:$0xff] }
  0x40   : > { %1257 = vmatpush3.xpose.msk.msra.mxu0 %vm462_vm0, %v412_v26  ;;  %v687_v26 = vld [vmem:[%s1775_s4 + $0x10] sm:$0xff] }
  0x41   : > { %1258 = vmatprep.subr.msk.mxu0 %vm462_vm0, %v427_v27  ;;  %v688_v27 = vld [vmem:[%s1775_s4 + $0x18] sm:$0xff] }
  0x44   : > { %1259 = vmatpush3.xpose.msk.msra.mxu0 %vm462_vm0, %v411_v28 }
  0x45   : > { %1260 = vmatprep.subr.msk.mxu0 %vm462_vm0, %v426_v29 }
  0x48   : > { %1261 = vmatpush3.xpose.msk.msra.mxu0 %vm462_vm0, %v410_v30 }
  0x49   : > { %1262 = vmatprep.subr.msk.mxu0 %vm462_vm0, %v425_v31 }
  0x4c   : > { %1263 = vmatpush3.xpose.msk.msra.mxu0 %vm462_vm0, %v409_v32 }
  0x4d   : > { %1264 = vmatprep.subr.msk.mxu0 %vm462_vm0, %v424_v33 }
  0x50   : > { %1265 = vmatpush3.xpose.msk.msra.mxu0 %vm462_vm0, %v408_v34 }
  0x51   : > { %1266 = vmatprep.subr.msk.mxu0 %vm462_vm0, %v423_v35 }
  0x54   : > { %1267 = vmatpush3.xpose.msk.msra.mxu0 %vm462_vm0, %v407_v36 }
  0x55   : > { %1268 = vmatprep.subr.msk.mxu0 %vm462_vm0, %v422_v37 }
  0x58   : > { %1269 = vmatpush3.xpose.msk.msra.mxu0 %vm462_vm0, %v406_v38 }
  0x59   : > { %1270 = vmatprep.subr.msk.mxu0 %vm462_vm0, %v421_v39 }
  0x5c   : > { %1271 = vmatpush3.xpose.msk.msra.mxu0 %vm462_vm0, %v405_v40 }
  0x5d   : > { %1272 = vmatprep.subr.msk.mxu0 %vm462_vm0, %v420_v41 }
  0x60   : > { %1273 = vmatpush3.xpose.msk.msra.mxu0 %vm462_vm0, %v404_v42 }
  0x61   : > { %1274 = vmatprep.subr.msk.mxu0 %vm462_vm0, %v419_v43  ;;  %v823_v43 = vstv %s1188_s21 }
  0x64   : > { %1275 = vmatpush3.xpose.msk.msra.mxu0 %vm462_vm0, %v403_v44 }
  0x65   : > { %1276 = vmatprep.subr.msk.mxu0 %vm462_vm0, %v418_v45 }
  0x68   : > { %1277 = vmatpush3.xpose.msk.msra.mxu0 %vm462_vm0, %v402_v46 }
  0x6b   : > { %1279 = vmatmul.mubr.msk.f32.vlgmr.msra.gmra.mxu0 %vm462_vm0, %v1549_v0 }
  0x6c   : > { %1280 = vmatprep.mubr.msk.f32.mxu0 %vm462_vm0, %v435_v47 }
  0x6f   : > { %1281 = vmatmul.mubr.msk.f32.gmra.mxu0 %vm462_vm0, %v435_v47 }
  0x70   : > { %1282 = vmatprep.mubr.msk.f32.mxu0 %vm462_vm0, %v436_v48 }
  0x73   : > { %1283 = vmatmul.mubr.msk.f32.gmra.mxu0 %vm462_vm0, %v436_v48 }
  0x74   : > { %1284 = vmatprep.mubr.msk.f32.mxu0 %vm462_vm0, %v437_v49 }
  0x77   : > { %1285 = vmatmul.mubr.msk.f32.gmra.mxu0 %vm462_vm0, %v437_v49 }
  0xa1   : > { %v460_v54 = vpop.permute.xlu0 %459 }
  0xa2   : > { %v450_v57 = vpop.permute.xlu1 %449 }
  0xa5   : > { %v455_v59 = vpop.permute.xlu0 %454 }
  0xa6   : > { %v445_v1 = vpop.permute.xlu1 %444 }
  0xa9   : > { %v711_v32 = vpop.permute.xlu0 %710 }
  0xaa   : > { %v706_v34 = vpop.permute.xlu1 %705 }
  0xad   : > { %v701_v39 = vpop.permute.xlu0 %700 }
  0xae   : > { %v696_v42 = vpop.permute.xlu1 %695 }
 0x12b   : > { %v637_v51 = vpop.f32.mrf.mxu0 }
 0x12c   : > { %v638_v10 = vadd.f32 %v637_v51, %v445_v1 }
 0x12d   : > { %v639_v52 = vpop.f32.mrf.mxu0 }
 0x12e   : > { %v640_v5 = vadd.f32 %v639_v52, %v445_v1  ;;  %v669_v18 = vmul.f32 %v668_v2, %v638_v10  ;;  %vm660_vm8 = vcmp.ge.f32.partialorder %v638_v10, 0.0  ;;  %v840_v1 = vld [vmem:[%s1777_s6] sm:$0xff] }
 0x12f   : > { %v643_v53 = vpop.f32.mrf.mxu0 }
 0x130   : > { %v644_v6 = vadd.f32 %v643_v53, %v450_v57  ;;  %v670_v16 = vmul.f32 %v668_v2, %v640_v5  ;;  %vm661_vm7 = vcmp.ge.f32.partialorder %v640_v5, 0.0  ;;  %v677_v24 = vsel %vm660_vm8, %v638_v10, %v669_v18  ;;  %v866_v10 = vpop.permute.xlu0 %865 }
 0x131   : > { %v645_v55 = vpop.f32.mrf.mxu0 }
 0x132   : > { %v646_v3 = vadd.f32 %v645_v55, %v450_v57  ;;  %v671_v14 = vmul.f32 %v668_v2, %v644_v6  ;;  %vm662_vm6 = vcmp.ge.f32.partialorder %v644_v6, 0.0  ;;  %v678_v22 = vsel %vm661_vm7, %v640_v5, %v670_v16  ;;  %v843_v5 = vld [vmem:[%s1777_s6 + $0x18] sm:$0xff] }
 0x133   : > { %v649_v56 = vpop.f32.mrf.mxu0 }
 0x134   : > { %v650_v63 = vadd.f32 %v649_v56, %v455_v59  ;;  %v672_v12 = vmul.f32 %v668_v2, %v646_v3  ;;  %vm663_vm5 = vcmp.ge.f32.partialorder %v646_v3, 0.0  ;;  %v679_v21 = vsel %vm662_vm6, %v644_v6, %v671_v14 }
 0x135   : > { %v651_v58 = vpop.f32.mrf.mxu0 }
 0x136   : > { %v652_v61 = vadd.f32 %v651_v58, %v455_v59  ;;  %v673_v11 = vmul.f32 %v668_v2, %v650_v63  ;;  %vm664_vm4 = vcmp.ge.f32.partialorder %v650_v63, 0.0  ;;  %v680_v20 = vsel %vm663_vm5, %v646_v3, %v672_v12  ;;  %v841_v3 = vld [vmem:[%s1777_s6 + $0x8] sm:$0xff]  ;;  %v861_v12 = vpop.permute.xlu1 %860 }
 0x137   : > { %v655_v60 = vpop.f32.mrf.mxu0 }
 0x138   : > { %v656_v62 = vadd.f32 %v655_v60, %v460_v54  ;;  %v674_v8 = vmul.f32 %v668_v2, %v652_v61  ;;  %vm665_vm3 = vcmp.ge.f32.partialorder %v652_v61, 0.0  ;;  %v681_v19 = vsel %vm664_vm4, %v650_v63, %v673_v11 }
 0x139   : > { %v657_v0 = vpop.f32.mrf.mxu0 }
 0x13a   : > { %v658_v4 = vadd.f32 %v657_v0, %v460_v54  ;;  %v675_v7 = vmul.f32 %v668_v2, %v656_v62  ;;  %vm666_vm2 = vcmp.ge.f32.partialorder %v656_v62, 0.0  ;;  %v682_v17 = vsel %vm665_vm3, %v652_v61, %v674_v8 }
 0x13c   : > { %vm667_vm1 = vcmp.ge.f32.partialorder %v658_v4, 0.0  ;;  %v676_v9 = vmul.f32 %v668_v2, %v658_v4  ;;  %v683_v15 = vsel %vm666_vm2, %v656_v62, %v675_v7 }
 0x13e   : > { %v684_v13 = vsel %vm667_vm1, %v658_v4, %v676_v9  ;;  %v842_v4 = vld [vmem:[%s1777_s6 + $0x10] sm:$0xff] }
 0x13f   : > { %750 = vmatprep.subr.mxu1 %v684_v13 }
 0x140   : > { %751 = vmatpush1.msra.mxu1 %v683_v15 }
 0x141   : > { %752 = vmatprep.subr.mxu1 %v682_v17  ;;  %v856_v17 = vpop.permute.xlu0 %855 }
 0x142   : > { %753 = vmatpush1.msra.mxu1 %v681_v19 }
 0x143   : > { %754 = vmatprep.subr.mxu1 %v680_v20  ;;  %v851_v20 = vpop.permute.xlu1 %850 }
 0x144   : > { %755 = vmatpush1.msra.mxu1 %v679_v21  ;;  %v977_v21 = vstv %s1189_s25 }
 0x145   : > { %756 = vmatprep.subr.mxu1 %v678_v22 }
 0x146   : > { %757 = vmatpush1.msra.mxu1 %v677_v24 }
 0x147   : > { %1226 = vmatmul.mubr.msk.f32.vlgmr.msra.gmra.mxu1 %vm713_vm9, %v685_v23 }
 0x148   : > { %796 = vmatprep.mubr.f32.mxu1 %v1422_v50 }
 0x14b   : > { %1227 = vmatmul.mubr.msk.f32.gmra.mxu1 %vm713_vm9, %v686_v25 }
 0x14c   : > { %802 = vmatprep.mubr.f32.mxu1 %v1422_v50 }
 0x14f   : > { %1228 = vmatmul.mubr.msk.f32.gmra.mxu1 %vm713_vm9, %v687_v26 }
 0x150   : > { %808 = vmatprep.mubr.f32.mxu1 %v1422_v50 }
 0x153   : > { %1229 = vmatmul.mubr.msk.f32.gmra.mxu1 %vm713_vm9, %v688_v27 }
 0x154   : > { %944 = vmatprep.mubr.f32.mxu1 %v1422_v50 }
 0x207   : > { %v792_v28 = vpop.f32.mrf.mxu1 }
 0x208   : > { %v793_v52 = vadd.f32 %v792_v28, %v696_v42 }
 0x209   : > { %v794_v29 = vpop.f32.mrf.mxu1 }
 0x20a   : > { %v795_v46 = vadd.f32 %v794_v29, %v696_v42  ;;  %v824_v60 = vmul.f32 %v823_v43, %v793_v52  ;;  %vm815_vm1 = vcmp.ge.f32.partialorder %v793_v52, 0.0 }
 0x20b   : > { %v798_v30 = vpop.f32.mrf.mxu1 }
 0x20c   : > { %v799_v47 = vadd.f32 %v798_v30, %v701_v39  ;;  %v825_v58 = vmul.f32 %v823_v43, %v795_v46  ;;  %vm816_vm0 = vcmp.ge.f32.partialorder %v795_v46, 0.0  ;;  %v832_v2 = vsel %vm815_vm1, %v793_v52, %v824_v60 }
 0x20d   : > { %v800_v31 = vpop.f32.mrf.mxu1 }
 0x20e   : > { %v801_v44 = vadd.f32 %v800_v31, %v701_v39  ;;  %v826_v56 = vmul.f32 %v823_v43, %v799_v47  ;;  %vm817_vm15 = vcmp.ge.f32.partialorder %v799_v47, 0.0  ;;  %v833_v0 = vsel %vm816_vm0, %v795_v46, %v825_v58 }
 0x20f   : > { %v804_v33 = vpop.f32.mrf.mxu1 }
 0x210   : > { %v805_v40 = vadd.f32 %v804_v33, %v706_v34  ;;  %v827_v54 = vmul.f32 %v823_v43, %v801_v44  ;;  %vm818_vm14 = vcmp.ge.f32.partialorder %v801_v44, 0.0  ;;  %v834_v63 = vsel %vm817_vm15, %v799_v47, %v826_v56 }
 0x211   : > { %v806_v35 = vpop.f32.mrf.mxu1 }
 0x212   : > { %v807_v37 = vadd.f32 %v806_v35, %v706_v34  ;;  %v828_v53 = vmul.f32 %v823_v43, %v805_v40  ;;  %vm819_vm13 = vcmp.ge.f32.partialorder %v805_v40, 0.0  ;;  %v835_v62 = vsel %vm818_vm14, %v801_v44, %v827_v54  ;;  %v999_v44 = vpop.permute.xlu0 %998 }
 0x213   : > { %v810_v36 = vpop.f32.mrf.mxu1 }
 0x214   : > { %v811_v38 = vadd.f32 %v810_v36, %v711_v32  ;;  %v829_v49 = vmul.f32 %v823_v43, %v807_v37  ;;  %vm820_vm12 = vcmp.ge.f32.partialorder %v807_v37, 0.0  ;;  %v836_v61 = vsel %vm819_vm13, %v805_v40, %v828_v53 }
 0x215   : > { %v812_v41 = vpop.f32.mrf.mxu1 }
 0x216   : > { %v813_v45 = vadd.f32 %v812_v41, %v711_v32  ;;  %v830_v48 = vmul.f32 %v823_v43, %v811_v38  ;;  %vm821_vm10 = vcmp.ge.f32.partialorder %v811_v38, 0.0  ;;  %v837_v59 = vsel %vm820_vm12, %v807_v37, %v829_v49  ;;  %v994_v41 = vld [vmem:[%s1779_s8] sm:$0x3] }
 0x218   : > { %v831_v51 = vmul.f32 %v823_v43, %v813_v45  ;;  %vm822_vm11 = vcmp.ge.f32.partialorder %v813_v45, 0.0  ;;  %v838_v57 = vsel %vm821_vm10, %v811_v38, %v830_v48 }
 0x21a   : > { %v839_v55 = vsel %vm822_vm11, %v813_v45, %v831_v51 }
 0x21b   : > { %904 = vmatprep.subr.mxu1 %v839_v55 }
 0x21c   : > { %905 = vmatpush1.msra.mxu1 %v838_v57 }
 0x21d   : > { %906 = vmatprep.subr.mxu1 %v837_v59 }
 0x21e   : > { %907 = vmatpush1.msra.mxu1 %v836_v61 }
 0x21f   : > { %908 = vmatprep.subr.mxu1 %v835_v62 }
 0x220   : > { %909 = vmatpush1.msra.mxu1 %v834_v63 }
 0x221   : > { %910 = vmatprep.subr.mxu1 %v833_v0 }
 0x222   : > { %911 = vmatpush1.msra.mxu1 %v832_v2 }
 0x223   : > { %1230 = vmatmul.mubr.msk.f32.vlgmr.msra.gmra.mxu1 %vm713_vm9, %v840_v1 }
 0x224   : > { %950 = vmatprep.mubr.f32.mxu1 %v1422_v50 }
 0x227   : > { %1231 = vmatmul.mubr.msk.f32.gmra.mxu1 %vm713_vm9, %v841_v3 }
 0x228   : > { %956 = vmatprep.mubr.f32.mxu1 %v1422_v50 }
 0x22b   : > { %1232 = vmatmul.mubr.msk.f32.gmra.mxu1 %vm713_vm9, %v842_v4 }
 0x22c   : > { %962 = vmatprep.mubr.f32.mxu1 %v1422_v50 }
 0x22f   : > { %1233 = vmatmul.mubr.msk.f32.gmra.mxu1 %vm713_vm9, %v843_v5 }
 0x230   : > { %1068 = vmatprep.mubr.f32.mxu1 %v1422_v50 }
 0x2e3   : > { %v946_v6 = vpop.f32.mrf.mxu1 }
 0x2e4   : > { %v947_v28 = vadd.f32 %v946_v6, %v851_v20 }
 0x2e5   : > { %v948_v7 = vpop.f32.mrf.mxu1 }
 0x2e6   : > { %v949_v50 = vadd.f32 %v948_v7, %v851_v20  ;;  %v978_v36 = vmul.f32 %v977_v21, %v947_v28  ;;  %vm969_vm10 = vcmp.ge.f32.partialorder %v947_v28, 0.0 }
 0x2e7   : > { %v952_v8 = vpop.f32.mrf.mxu1 }
 0x2e8   : > { %v953_v24 = vadd.f32 %v952_v8, %v856_v17  ;;  %v979_v34 = vmul.f32 %v977_v21, %v949_v50  ;;  %vm970_vm8 = vcmp.ge.f32.partialorder %v949_v50, 0.0  ;;  %v986_v42 = vsel %vm969_vm10, %v947_v28, %v978_v36 }
 0x2e9   : > { %v954_v9 = vpop.f32.mrf.mxu1 }
 0x2ea   : > { %v955_v22 = vadd.f32 %v954_v9, %v856_v17  ;;  %v980_v32 = vmul.f32 %v977_v21, %v953_v24  ;;  %vm971_vm7 = vcmp.ge.f32.partialorder %v953_v24, 0.0  ;;  %v987_v40 = vsel %vm970_vm8, %v949_v50, %v979_v34 }
 0x2eb   : > { %v958_v11 = vpop.f32.mrf.mxu1 }
 0x2ec   : > { %v959_v18 = vadd.f32 %v958_v11, %v861_v12  ;;  %v981_v30 = vmul.f32 %v977_v21, %v955_v22  ;;  %vm972_vm6 = vcmp.ge.f32.partialorder %v955_v22, 0.0  ;;  %v988_v39 = vsel %vm971_vm7, %v953_v24, %v980_v32 }
 0x2ed   : > { %v960_v13 = vpop.f32.mrf.mxu1 }
 0x2ee   : > { %v961_v15 = vadd.f32 %v960_v13, %v861_v12  ;;  %v982_v29 = vmul.f32 %v977_v21, %v959_v18  ;;  %vm973_vm5 = vcmp.ge.f32.partialorder %v959_v18, 0.0  ;;  %v989_v38 = vsel %vm972_vm6, %v955_v22, %v981_v30 }
 0x2ef   : > { %v964_v14 = vpop.f32.mrf.mxu1 }
 0x2f0   : > { %v965_v16 = vadd.f32 %v964_v14, %v866_v10  ;;  %v983_v26 = vmul.f32 %v977_v21, %v961_v15  ;;  %vm974_vm4 = vcmp.ge.f32.partialorder %v961_v15, 0.0  ;;  %v990_v37 = vsel %vm973_vm5, %v959_v18, %v982_v29 }
 0x2f1   : > { %v966_v19 = vpop.f32.mrf.mxu1 }
 0x2f2   : > { %v967_v23 = vadd.f32 %v966_v19, %v866_v10  ;;  %v984_v25 = vmul.f32 %v977_v21, %v965_v16  ;;  %vm975_vm2 = vcmp.ge.f32.partialorder %v965_v16, 0.0  ;;  %v991_v35 = vsel %vm974_vm4, %v961_v15, %v983_v26 }
 0x2f4   : > { %v985_v27 = vmul.f32 %v977_v21, %v967_v23  ;;  %vm976_vm3 = vcmp.ge.f32.partialorder %v967_v23, 0.0  ;;  %v992_v33 = vsel %vm975_vm2, %v965_v16, %v984_v25 }
 0x2f6   : > { %v993_v31 = vsel %vm976_vm3, %v967_v23, %v985_v27 }
 0x2f7   : > { %1028 = vmatprep.subr.mxu1 %v993_v31 }
 0x2f8   : > { %1029 = vmatpush1.msra.mxu1 %v992_v33 }
 0x2f9   : > { %1030 = vmatprep.subr.mxu1 %v991_v35 }
 0x2fa   : > { %1031 = vmatpush1.msra.mxu1 %v990_v37 }
 0x2fb   : > { %1032 = vmatprep.subr.mxu1 %v989_v38 }
 0x2fc   : > { %1033 = vmatpush1.msra.mxu1 %v988_v39 }
 0x2fd   : > { %1034 = vmatprep.subr.mxu1 %v987_v40 }
 0x2fe   : > { %1035 = vmatpush1.msra.mxu1 %v986_v42 }
 0x2ff   : > { %1234 = vmatmul.mubr.msk.f32.vlgmr.msra.gmra.mxu1 %vm713_vm9, %v994_v41 }
 0x3bf   : > { %v1070_v43 = vpop.f32.mrf.mxu1 }
 0x3c0   : > { %v1071_v46 = vadd.f32 %v1070_v43, %v999_v44 }
 0x3c1   : > { %v1072_v45 = vpop.f32.mrf.mxu1 }
 0x3c2   : > { %v1073_v47 = vadd.f32 %v1072_v45, %v999_v44  ;;  %1094 = sbr.rel (!%p1517_p5) target bundleno = 993 (0x3e1), region = 68 }
 0x3c4   : > { %v1077_v48 = vcombine.low %v1071_v46, %v1073_v47 }
 0x3c6   : > { %1235 = vst.sshfl [vmem:[%s379_s28] sm:$0x33 pattern:$0x76325410] %v1077_v48 }
 0x3c7   : > { %s1792_s12 = smov (!%p1097_p9, %s1096_s12), 2 }
 0x3c8   : > { %s1729_s18 = sshll.u32 %s1792_s12, 5 }
 0x3c9   : > { %s1101_s20 = ssub.s32 64, %s1729_s18 }
 0x3ca   : > { %1102 = vsyncadd %s1724_s29, %s1101_s20  ;;  %p1239_p10 = scmp.ne.s32.totalorder %s1729_s18, 0  ;;  %s1245_s25 = sshll.u32 %s1500_s17, 6 }
 0x3cb   : > { %s1105_s21 = scalar_lea.hbm %s1781_s10, %s1245_s25  ;;  %s1108_s11 = sshll.u32 %s379_s28, 4  ;;  %s1109_s11 = int_to_ptr.vmem [resolvable:$true] %s1108_s11 }
 0x3cc   : > { %s1354_s27 = scalar_lea.vmem %s1109_s11, %s1729_s18  ;;  %s1423_s30 = smov [#allocation5]  }
 0x3cd   : > { %p1355_p5 = scmp.ne.s32.totalorder %s1109_s11, %s1354_s27  ;;  %s1358_s12 = sshll.u32 %s1423_s30, 4  ;;  %s1359_s12 = int_to_ptr.vmem [resolvable:$false] %s1358_s12 }
 0x3ce   : > { %s1360_s20 = scalar_lea.vmem %s1359_s12, 128  ;;  %p1361_p0 = scmp.lt.s32.totalorder %s1109_s11, %s1359_s12 }
 0x3cf   : > { %p1356_p12 = pnand %p1355_p5, %p1239_p10  ;;  %p1362_p1 = scmp.lt.s32.totalorder %s1360_s20, %s1354_s27 }
 0x3d1   : > { %p1357_p13 = pneg %p1356_p12  ;;  %p1363_p2 = por %p1362_p1, %p1361_p0 }
 0x3d3   : > { %p1364_p3 = pnand %p1363_p2, %p1357_p13 }
 0x3d5   : > { %1367 = shalt.err (!%p1364_p3)
}
 0x3d6   : > { %s1368_s17 = scalar_lea.hbm %s1105_s21, %s1729_s18  ;;  %s1372_s26 = scalar_lea.hbm %s1781_s10, 96 }
 0x3d7   : > { %p1369_p4 = scmp.ne.s32.totalorder %s1105_s21, %s1368_s17  ;;  %p1373_p11 = scmp.lt.s32.totalorder %s1105_s21, %s1781_s10 }
 0x3d8   : > { %p1374_p9 = scmp.lt.s32.totalorder %s1372_s26, %s1368_s17 }
 0x3d9   : > { %p1370_p7 = pnand %p1369_p4, %p1239_p10 }
 0x3da   : > { %p1375_p5 = por %p1374_p9, %p1373_p11 }
 0x3db   : > { %p1371_p8 = pneg %p1370_p7 }
 0x3dd   : > { %p1376_p12 = pnand %p1375_p5, %p1371_p8 }
 0x3df   : > { %1379 = shalt.err (!%p1376_p12)
}
 0x3e0   : > { %1111 = dma.vmem_to_hbm [thread:$0]  (%p1239_p10), %s1109_s11, %s1729_s18, %s1105_s21, %s1724_s29  }
 0x3e1 PF: > { %p1301_p13 = scmp.ge.s32.totalorder %s1418_s16, 2  ;;  %s1120_s27 = sand.u32 1, %s1406_s13  }
 0x3e2   : > { %s1121_s12 = scalar_lea.sflag [#allocation3], %s1120_s27 }
 0x3e3   : > { %p1296_p0 = pnand %p1301_p13, %p1521_p6 }
 0x3e5   : > { %p1297_p1 = pneg %p1296_p0 }
 0x3e7   : > { %1401 = dma.done.wait (%p1297_p1), %s1121_s12, 64  }
 0x3e8   : > { %1403 = vsyncadd (%p1297_p1), %s1121_s12, 4294967232  ;;  %p21_p2 = scmp.ge.s32.totalorder %s1504_s19, 4   ;;  %s1785_s13 = smov %s1410_s14 }
 0x3e9   : > { %s1786_s14 = smov %s1414_s15  ;;  %s1787_s15 = smov %s1515_s22 }
 0x3ea   : > { %s1788_s16 = smov %s1504_s19  ;;  %23 = sbr.rel (!%p21_p2) target bundleno = 4 (0x4), region = 100 }
 0x3ef   :  { %1126 = vsyncpa [#allocation3], 1 }
 0x3f0   :  { %1128 = vsyncpa [#allocation3 + $0x1], 1 }
 0x3f1   :  { %1129 = vsyncpa [#allocation4], 1 }
 0x3f2   :  { %1131 = vsyncpa [#allocation4 + $0x1], 1 }

</bundles_post_ra>
